<compile_context>
chip_gen: v5e
topology: v5e:2x2
jax: 0.10.0
libtpu: 0.0.40
codegen_flags: <defaults>
</compile_context>

<pallas_src>
import functools

import jax
import jax.numpy as jnp
from jax import lax
from jax.experimental import pallas as pl
from jax.experimental.pallas import tpu as pltpu


def _ce_kernel(logits_ref, tgt_ref, out_ref, *, ignore_label, hw, tile_p):
    # logits_ref: (1, C, TILE_P) in the original HBM dtype
    # tgt_ref:    (1, 1, TILE_P) int32
    # out_ref:    (1, 1, 1, 128) f32 -- per-tile partials [loss_sum, count]
    j = pl.program_id(1)

    x = logits_ref[...]                                      # (1, C, TP) native dtype
    tgt = tgt_ref[...]                                       # (1, 1, TP) int32

    # Ragged-tail mask: pixels past H*W in the last block are invalid.
    pix = j * tile_p + lax.broadcasted_iota(jnp.int32, tgt.shape, 2)
    valid = (tgt != ignore_label) & (pix < hw)               # (1, 1, TP) bool

    # Numerically stable log-sum-exp over the class axis.
    # max / subtract in the native dtype (exact for f32, native bf16 VALU on
    # v6e/v7x); only the exp/sum/log path runs in f32.
    m = jnp.max(x, axis=1, keepdims=True)                    # (1, 1, TP)
    ex = jnp.exp((x - m).astype(jnp.float32))                # (1, C, TP) f32
    lse = m.astype(jnp.float32) + jnp.log(
        jnp.sum(ex, axis=1, keepdims=True))                  # (1, 1, TP) f32

    # Target-class logit via one-hot select (no dynamic gather on TPU).
    # Class iota is (1, C, 1); the comparison broadcasts it across lanes.
    cls = lax.broadcasted_iota(jnp.int32, (1, x.shape[1], 1), 1)
    tgt_logit = jnp.sum(jnp.where(cls == tgt, x, 0), axis=1,
                        keepdims=True).astype(jnp.float32)   # (1, 1, TP) f32

    # Select (not multiply) so garbage in the padded tail / ignored pixels
    # (possibly inf/nan) never propagates into the sums.
    per_pixel = jnp.where(valid, lse - tgt_logit, 0.0)       # (1, 1, TP) f32
    validf = jnp.where(valid, 1.0, 0.0)

    loss_s = jnp.sum(per_pixel)
    cnt_s = jnp.sum(validf)

    # Lane-dense (1, 128) output row: loss partial at lane 0, count at lane 1.
    col = lax.broadcasted_iota(jnp.int32, out_ref.shape, 3)
    out_ref[...] = jnp.where(col == 0, loss_s,
                             jnp.where(col == 1, cnt_s, 0.0))


def _pick_tile(HW, C, N, itemsize):
    """C-aware pixel-tile selection with generation-aware VMEM budgeting."""
    try:
        vmem_cap = int(pltpu.get_tpu_info().vmem_capacity_bytes)
    except Exception:
        vmem_cap = 64 << 20  # conservative (v7x per-TC physical VMEM)

    # Per-pixel VMEM footprint: double-buffered logits + labels blocks, plus
    # the in-kernel f32 temporaries (~5 full-width passes over C x TILE_P),
    # plus small (1,1,TP) vectors.
    bytes_per_pixel = 2 * C * itemsize + 2 * 4 + 5 * C * 4 + 4 * 4

    if vmem_cap <= (64 << 20):   # v7x: 64 MiB physical VMEM per TensorCore
        vmem_budget = 24 << 20
    else:                        # v5e / v6e: 128 MiB physical VMEM
        vmem_budget = 48 << 20

    tile_vmem = max(128, vmem_budget // bytes_per_pixel)
    # DMA-friendly target: keep each logits block around 2-4 MiB.
    tile_dma = max(128, (4 << 20) // max(C * itemsize, 1))
    # Cap pixels-per-tile to bound f32 partial-sum accumulation error.
    tile_p = min(HW, tile_vmem, tile_dma, 1 << 16)

    # v7x megacore: keep >= ~8 total grid blocks when the problem is big
    # enough so the ("parallel","parallel") grid can split across both TCs.
    min_blocks = 8
    want_nb = -(-min_blocks // max(N, 1))
    if want_nb > 1 and HW >= want_nb * 128:
        tile_p = min(tile_p, max(128, (HW // want_nb) // 128 * 128))

    if tile_p >= HW:
        tile_p = HW                      # full last dim (always legal)
    else:
        tile_p = max(128, (tile_p // 128) * 128)

    footprint = tile_p * bytes_per_pixel + (1 << 20)
    vmem_limit = int(min(max(footprint + (8 << 20), 16 << 20),
                         max(16 << 20, vmem_cap * 3 // 4)))
    return tile_p, vmem_limit


def cross_entropy_loss(target, score, ignore_label=-1):
    """Equivalent of CrossEntropy.forward(target, score) from loss/loss_sets.py."""
    N, C, H, W = score.shape
    th, tw = int(target.shape[1]), int(target.shape[2])
    if (H, W) != (th, tw):
        # glue: bilinear resize of logits to the label resolution (plain JAX).
        # TODO(synk): fuse the bilinear upsample into the kernel (gather source
        # rows per pixel tile) to avoid a full-resolution HBM pass; also legacy
        # F.upsample align_corners semantics differ slightly from
        # jax.image.resize half-pixel bilinear.
        score = jax.image.resize(score, (N, C, th, tw),
                                 method="bilinear").astype(score.dtype)
        H, W = th, tw

    HW = H * W
    itemsize = jnp.dtype(score.dtype).itemsize
    tile_p, vmem_limit = _pick_tile(HW, C, N, itemsize)
    nb = pl.cdiv(HW, tile_p)

    # Free reshapes only -- keep HBM dtype (bf16 logits stay bf16 in HBM).
    logits = score.reshape(N, C, HW)
    tgt = target.reshape(N, 1, HW).astype(jnp.int32)

    kernel = functools.partial(
        _ce_kernel, ignore_label=ignore_label, hw=HW, tile_p=tile_p)

    partials = pl.pallas_call(
        kernel,
        out_shape=jax.ShapeDtypeStruct((N, nb, 1, 128), jnp.float32),
        grid_spec=pltpu.PrefetchScalarGridSpec(
            num_scalar_prefetch=0,
            grid=(N, nb),
            in_specs=[
                pl.BlockSpec((1, C, tile_p), lambda n, j: (n, 0, j)),
                pl.BlockSpec((1, 1, tile_p), lambda n, j: (n, 0, j)),
            ],
            out_specs=pl.BlockSpec((1, 1, 1, 128), lambda n, j: (n, j, 0, 0)),
        ),
        compiler_params=pltpu.CompilerParams(
            dimension_semantics=("parallel", "parallel"),
            vmem_limit_bytes=vmem_limit),
    )(logits, tgt)

    loss_sum = jnp.sum(partials[:, :, 0, 0])
    count = jnp.sum(partials[:, :, 0, 1])
    # mean over non-ignored pixels (matches nn.CrossEntropyLoss reduction='mean';
    # all-ignored input yields NaN, same as PyTorch).
    return loss_sum / count


def _reference_loss(target, score, ignore_label=-1):
    """Pure-JAX reference for correctness checking."""
    N, C, H, W = score.shape
    logits = jnp.transpose(score, (0, 2, 3, 1)).reshape(-1, C)
    tgt = target.reshape(-1)
    valid = tgt != ignore_label
    safe_tgt = jnp.where(valid, tgt, 0)
    logp = jax.nn.log_softmax(logits, axis=-1)
    nll = -jnp.take_along_axis(logp, safe_tgt[:, None], axis=-1)[:, 0]
    nll = jnp.where(valid, nll, 0.0)
    return jnp.sum(nll) / jnp.sum(valid.astype(jnp.float32))


if __name__ == "__main__":
    key = jax.random.PRNGKey(0)
    k1, k2, k3 = jax.random.split(key, 3)

    N, C, H, W = 2, 4, 16, 16
    ignore_label = -1

    # score: NCHW logits
    score = jax.random.normal(k1, (N, C, H, W), dtype=jnp.float32)
    # target: NHW labels in [0, C), with some pixels set to ignore_label
    target = jax.random.randint(k2, (N, H, W), 0, C, dtype=jnp.int32)
    ignore_mask = jax.random.uniform(k3, (N, H, W)) < 0.1
    target = jnp.where(ignore_mask, jnp.int32(ignore_label), target)

    loss = cross_entropy_loss(target, score, ignore_label=ignore_label)
    loss = jax.block_until_ready(loss)

    ref = _reference_loss(target, score, ignore_label=ignore_label)
    assert jnp.allclose(loss, ref, atol=1e-5, rtol=1e-5), (loss, ref)

    print("KERNEL_OK")
</pallas_src>

<mosaic_0001>
module attributes {stable_mosaic.version = 11 : i64} {
  func.func @_ce_kernel(%arg0: i32, %arg1: i32, %arg2: memref<1x4x256xf32, #tpu.memory_space<vmem>>, %arg3: memref<1x1x256xi32, #tpu.memory_space<vmem>>, %arg4: memref<1x1x1x128xf32, #tpu.memory_space<vmem>>) attributes {dimension_semantics = [#tpu.dimension_semantics<parallel>, #tpu.dimension_semantics<parallel>], iteration_bounds = array<i64: 2, 1>, scalar_prefetch = 0 : i64, scratch_operands = 0 : i64, tpu.core_type = #tpu.core_type<tc>, window_params = [{transform_indices = @transform_0, window_bounds = array<i64: 1, 4, 256>}, {transform_indices = @transform_1, window_bounds = array<i64: 1, 1, 256>}, {transform_indices = @transform_2, window_bounds = array<i64: 1, 1, 1, 128>}]} {
    %c0 = arith.constant 0 : index
    %c0_0 = arith.constant 0 : index
    %c0_1 = arith.constant 0 : index
    %0 = vector.load %arg2[%c0, %c0_0, %c0_1] : memref<1x4x256xf32, #tpu.memory_space<vmem>>, vector<1x4x256xf32>
    %c0_2 = arith.constant 0 : index
    %c0_3 = arith.constant 0 : index
    %c0_4 = arith.constant 0 : index
    %1 = vector.load %arg3[%c0_2, %c0_3, %c0_4] : memref<1x1x256xi32, #tpu.memory_space<vmem>>, vector<1x1x256xi32>
    %c256_i32 = arith.constant 256 : i32
    %2 = arith.muli %arg1, %c256_i32 : i32
    %3 = tpu.iota {dimensions = array<i32: 2>} : vector<1x1x256xi32>
    %4 = vector.broadcast %2 : i32 to vector<1x1x256xi32>
    %5 = arith.addi %4, %3 : vector<1x1x256xi32>
    %c-1_i32 = arith.constant -1 : i32
    %6 = vector.broadcast %c-1_i32 : i32 to vector<1x1x256xi32>
    %7 = arith.cmpi ne, %1, %6 : vector<1x1x256xi32>
    %c256_i32_5 = arith.constant 256 : i32
    %8 = vector.broadcast %c256_i32_5 : i32 to vector<1x1x256xi32>
    %9 = arith.cmpi slt, %5, %8 : vector<1x1x256xi32>
    %10 = arith.andi %7, %9 : vector<1x1x256xi1>
    %cst = arith.constant dense<0xFF800000> : vector<1x256xf32>
    %11 = vector.multi_reduction <maximumf>, %0, %cst [1] : vector<1x4x256xf32> to vector<1x256xf32>
    %12 = vector.shape_cast %11 : vector<1x256xf32> to vector<1x1x256xf32>
    %13 = vector.broadcast %12 : vector<1x1x256xf32> to vector<1x4x256xf32>
    %14 = arith.subf %0, %13 : vector<1x4x256xf32>
    %15 = math.exp %14 : vector<1x4x256xf32>
    %cst_6 = arith.constant dense<0.000000e+00> : vector<1x256xf32>
    %16 = vector.multi_reduction <add>, %15, %cst_6 [1] : vector<1x4x256xf32> to vector<1x256xf32>
    %17 = vector.shape_cast %16 : vector<1x256xf32> to vector<1x1x256xf32>
    %18 = math.log %17 : vector<1x1x256xf32>
    %19 = arith.addf %12, %18 : vector<1x1x256xf32>
    %20 = tpu.iota {dimensions = array<i32: 1>} : vector<1x4x1xi32>
    %21 = vector.broadcast %20 : vector<1x4x1xi32> to vector<1x4x256xi32>
    %22 = vector.broadcast %1 : vector<1x1x256xi32> to vector<1x4x256xi32>
    %23 = arith.cmpi eq, %21, %22 : vector<1x4x256xi32>
    %c0_i32 = arith.constant 0 : i32
    %24 = arith.sitofp %c0_i32 : i32 to f32
    %25 = vector.broadcast %24 : f32 to vector<1x4x256xf32>
    %26 = arith.select %23, %0, %25 : vector<1x4x256xi1>, vector<1x4x256xf32>
    %cst_7 = arith.constant dense<0.000000e+00> : vector<1x256xf32>
    %27 = vector.multi_reduction <add>, %26, %cst_7 [1] : vector<1x4x256xf32> to vector<1x256xf32>
    %28 = vector.shape_cast %27 : vector<1x256xf32> to vector<1x1x256xf32>
    %29 = arith.subf %19, %28 : vector<1x1x256xf32>
    %cst_8 = arith.constant 0.000000e+00 : f32
    %30 = vector.broadcast %cst_8 : f32 to vector<1x1x256xf32>
    %31 = arith.select %10, %29, %30 : vector<1x1x256xi1>, vector<1x1x256xf32>
    %cst_9 = arith.constant 1.000000e+00 : f32
    %cst_10 = arith.constant 0.000000e+00 : f32
    %32 = vector.broadcast %cst_9 : f32 to vector<1x1x256xf32>
    %33 = vector.broadcast %cst_10 : f32 to vector<1x1x256xf32>
    %34 = arith.select %10, %32, %33 : vector<1x1x256xi1>, vector<1x1x256xf32>
    %35 = vector.shape_cast %31 : vector<1x1x256xf32> to vector<1x1x1x256xf32>
    %cst_11 = arith.constant dense<0.000000e+00> : vector<1xf32>
    %36 = vector.multi_reduction <add>, %35, %cst_11 [1, 2, 3] : vector<1x1x1x256xf32> to vector<1xf32>
    %37 = vector.shape_cast %36 : vector<1xf32> to vector<1x1x1x1xf32>
    %38 = vector.extract %37[0, 0, 0, 0] : f32 from vector<1x1x1x1xf32>
    %39 = vector.shape_cast %34 : vector<1x1x256xf32> to vector<1x1x1x256xf32>
    %cst_12 = arith.constant dense<0.000000e+00> : vector<1xf32>
    %40 = vector.multi_reduction <add>, %39, %cst_12 [1, 2, 3] : vector<1x1x1x256xf32> to vector<1xf32>
    %41 = vector.shape_cast %40 : vector<1xf32> to vector<1x1x1x1xf32>
    %42 = vector.extract %41[0, 0, 0, 0] : f32 from vector<1x1x1x1xf32>
    %43 = tpu.iota {dimensions = array<i32: 3>} : vector<1x1x1x128xi32>
    %c0_i32_13 = arith.constant 0 : i32
    %44 = vector.broadcast %c0_i32_13 : i32 to vector<1x1x1x128xi32>
    %45 = arith.cmpi eq, %43, %44 : vector<1x1x1x128xi32>
    %c1_i32 = arith.constant 1 : i32
    %46 = vector.broadcast %c1_i32 : i32 to vector<1x1x1x128xi32>
    %47 = arith.cmpi eq, %43, %46 : vector<1x1x1x128xi32>
    %cst_14 = arith.constant 0.000000e+00 : f32
    %48 = vector.broadcast %42 : f32 to vector<1x1x1x128xf32>
    %49 = vector.broadcast %cst_14 : f32 to vector<1x1x1x128xf32>
    %50 = arith.select %47, %48, %49 : vector<1x1x1x128xi1>, vector<1x1x1x128xf32>
    %51 = vector.broadcast %38 : f32 to vector<1x1x1x128xf32>
    %52 = arith.select %45, %51, %50 : vector<1x1x1x128xi1>, vector<1x1x1x128xf32>
    %c0_15 = arith.constant 0 : index
    %c0_16 = arith.constant 0 : index
    %c0_17 = arith.constant 0 : index
    %c0_18 = arith.constant 0 : index
    %53 = vector.load %arg4[%c0_15, %c0_16, %c0_17, %c0_18] : memref<1x1x1x128xf32, #tpu.memory_space<vmem>>, vector<1x1x1x128xf32>
    tpu.vector_store %arg4[%c0_15, %c0_16, %c0_17, %c0_18], %52 {strides = array<i32>} : memref<1x1x1x128xf32, #tpu.memory_space<vmem>>, vector<1x1x1x128xf32>,
    return
  }
  func.func @transform_0(%arg0: i32, %arg1: i32) -> (i32, i32, i32) {
    %c0_i32 = arith.constant 0 : i32
    %c0_i32_0 = arith.constant 0 : i32
    return %arg0, %c0_i32, %arg1 : i32, i32, i32
  }
  func.func @transform_1(%arg0: i32, %arg1: i32) -> (i32, i32, i32) {
    %c0_i32 = arith.constant 0 : i32
    %c0_i32_0 = arith.constant 0 : i32
    return %arg0, %c0_i32, %arg1 : i32, i32, i32
  }
  func.func @transform_2(%arg0: i32, %arg1: i32) -> (i32, i32, i32, i32) {
    %c0_i32 = arith.constant 0 : i32
    %c0_i32_0 = arith.constant 0 : i32
    %c0_i32_1 = arith.constant 0 : i32
    return %arg0, %arg1, %c0_i32, %c0_i32_0 : i32, i32, i32, i32
  }
}

</mosaic_0001>

<bundles_post_ra>
// kernel: tpu_custom_call.1
= control target key start
LH: loop header
LB: loop body
LE: loop exit
PB: predicated region body
PF: predicated region fallthrough
CT: control target
= control target key end

     0   :  { %7 = vsyncpa [#allocation3], 0  ;;  %s905_s0 = inlined_call_operand.hbm [shape: f32[2,4,256], index: 0, kind: input, shape index: {}]   ;;  %s906_s1 = inlined_call_operand.hbm [shape: s32[2,1,256], index: 1, kind: input, shape index: {}]   ;;  %s907_s2 = inlined_call_operand.hbm [shape: f32[2,1,1,128], index: 2, kind: output, shape index: {}]  }
   0x1   :  { %9 = vsyncpa [#allocation3 + $0x1], 0 }
   0x2   :  { %10 = vsyncpa [#allocation6], 0 }
   0x3   :  { %12 = vsyncpa [#allocation6 + $0x1], 0 }
   0x4   :  { %13 = vsyncpa [#allocation4], 0 }
   0x5   :  { %15 = vsyncpa [#allocation4 + $0x1], 0  ;;  %s751_s9 = smov 0   ;;  %s753_s10 = smov 0  }
   0x6   :  { %s755_s11 = smov 0   ;;  %s757_s12 = smov 0  }
   0x7   :  { %s759_s13 = smov 0   ;;  %s761_s14 = smov 0  }
   0x8 LB: > { %s492_s15 = sadd.s32 4294967295, %s732_s14   ;;  %s493_s16 = sadd.s32 4294967294, %s732_s14   ;;  %s732_s14 = sphi %s761_s14, %s21_s14   ;;  %s728_s13 = sphi %s759_s13, %s917_s13   ;;  %s724_s12 = sphi %s757_s12, %s916_s12   ;;  %s720_s11 = sphi %s755_s11, %s915_s11   ;;  %s716_s10 = sphi %s753_s10, %s914_s10   ;;  %s712_s9 = sphi %s751_s9, %s913_s9  }
   0x9   : > { %s33_s17 = sadd.s32 1, %s728_s13  ;;  %s42_s18 = sadd.s32 1, %s720_s11 }
   0xa   : > { %p35_p0 = scmp.ge.s32.totalorder %s33_s17, 2  ;;  %p49_p1 = scmp.ne.s32.totalorder %s720_s11, %s716_s10 }
   0xb   : > { %p50_p2 = scmp.eq.s32.totalorder %s732_s14, 0  ;;  %p55_p3 = scmp.ne.s32.totalorder %s716_s10, %s712_s9 }
   0xc   : > { %s919_s17 = smov (%p35_p0, %s33_s17), 0  ;;  %p56_p5 = scmp.eq.s32.totalorder %s492_s15, 0 }
   0xd   : > { %p792_p4 = por %p50_p2, %p49_p1  ;;  %s37_s20 = ssub.s32 %s728_s13, %s919_s17 }
   0xe   : > { %p109_p6 = scmp.eq.s32.totalorder %s492_s15, 1  ;;  %p40_p7 = scmp.eq.s32.totalorder %s37_s20, 0 }
   0xf   : > { %p798_p8 = por %p56_p5, %p55_p3  ;;  %p115_p10 = scmp.eq.s32.totalorder %s493_s16, 1 }
  0x10   : > { %p802_p9 = por %p109_p6, %p49_p1  ;;  %p495_p12 = scmp.ge.s32.totalorder %s732_s14, 2 }
  0x11   : > { %s807_s23 = scalar_select %p40_p7, %s720_s11, %s42_s18  }
  0x12   : > { %p809_p11 = por %p115_p10, %p55_p3  ;;  %p528_p13 = scmp.lt.s32.totalorder %s732_s14, 2 }
  0x13   : > { %s135_s25 = sand.u32 1, %s720_s11   ;;  %s506_s27 = sshll.u32 %s728_s13, 3 }
  0x14   : > { %s496_s26 = sshll.u32 %s135_s25, 3  ;;  %s146_s30 = scalar_lea.hbm %s905_s0, %s506_s27 }
  0x15   : > { %s139_s3 = scalar_lea.vmem [#allocation2], %s496_s26  ;;  %s148_s5 = sshll.u32 %s146_s30, 4  ;;  %s149_s5 = int_to_ptr.hbm [resolvable:$true] %s148_s5 }
  0x16   : > { %s150_s4 = sshll.u32 %s139_s3, 4  ;;  %p822_p0 = pnand %p528_p13, %p792_p4  ;;  %s151_s4 = int_to_ptr.vmem [resolvable:$true] %s150_s4 }
  0x17   : > { %p501_p1 = scmp.ge.s32.totalorder %s732_s14, 1  ;;  %p176_p2 = scmp.lt.s32.totalorder %s732_s14, 3 }
  0x18   : > { %s136_s7 = scalar_lea.sflag [#allocation3], %s135_s25  ;;  %s499_s8 = sshll.u32 %s135_s25, 1 }
  0x19   : > { %520 = dma.hbm_to_vmem [thread:$0]  (!%p822_p0), %s149_s5, 128, %s151_s4, %s136_s7  }
  0x1a   : > { %p177_p3 = pnand %p501_p1, %p176_p2  ;;  %s500_s15 = sshll.u32 %s728_s13, 1 }
  0x1b   : > { %s167_s20 = scalar_lea.hbm %s906_s1, %s500_s15  ;;  %s161_s26 = scalar_lea.vmem [#allocation5], %s499_s8 }
  0x1c   : > { %s171_s19 = sshll.u32 %s161_s26, 4  ;;  %s169_s27 = sshll.u32 %s167_s20, 4  ;;  %s172_s19 = int_to_ptr.vmem [resolvable:$true] %s171_s19  ;;  %s170_s27 = int_to_ptr.hbm [resolvable:$true] %s169_s27 }
  0x1d   : > { %s158_s28 = scalar_lea.sflag [#allocation6], %s135_s25  ;;  %180 = sbr.rel (%p177_p3) target bundleno = 310 (0x136), region = 28 }
  0x1e   : > { %523 = dma.hbm_to_vmem [thread:$0]  (!%p822_p0), %s170_s27, 32, %s172_s19, %s158_s28  }
  0x1f   : > { %s837_s29 = sand.u32 (!%p177_p3), 1, %s716_s10  }
  0x20   : > { %s502_s30 = sshll.u32 (!%p177_p3), %s837_s29, 3  ;;  %s183_s3 = scalar_lea.sflag (!%p177_p3), [#allocation3], %s837_s29 }
  0x21   : > { %s186_s4 = scalar_lea.vmem (!%p177_p3), [#allocation2], %s502_s30 }
  0x22   : > { %699 = dma.done.wait (%p798_p8), %s183_s3, 128  }
  0x23   : > { %701 = vsyncadd (%p798_p8), %s183_s3, 4294967168  ;;  %s503_s25 = sshll.u32 %s837_s29, 1  ;;  %s193_s5 = scalar_lea.sflag [#allocation6], %s837_s29 }
  0x24   : > { %s196_s6 = scalar_lea.vmem [#allocation5], %s503_s25 }
  0x25   : > { %703 = dma.done.wait (%p798_p8), %s193_s5, 32  }
  0x26   : > { %705 = vsyncadd (%p798_p8), %s193_s5, 4294967264  ;;  %v224_v0 = vld [vmem:[%s186_s4] sm:$0xff]  ;;  %vm249_vm0 = vcmask 1043456   ;;  %v227_v22 = vlaneseq  ;;  %v225_v23 = vld [vmem:[%s196_s6] sm:$0x3]  ;;  %v734_v57 = vmov 1   ;;  %s385_s8 = scalar_lea.hbm %s907_s2, %s724_s12 }
  0x27   : > { %244 = vst [vmem:[#allocation1] ss:$2 sm:$0xff] %v224_v0  ;;  %v300_v31 = vperm.slane %v225_v23, 0  ;;  %v301_v32 = vperm.slane %v225_v23, 1  ;;  %v238_v58 = vrot.slane %v734_v57, 7  ;;  %vm239_vm3 = vcmask 1040384  }
  0x28   : > { %v299_v28 = vshrl.u32 %v227_v22, 7  ;;  %vm233_vm4 = vcmp.ne.s32.totalorder %v225_v23, 4294967295  ;;  %s221_s15 = scalar_lea.vmem [#allocation7], %s837_s29  ;;  %s389_s20 = sshll.u32 %s385_s8, 4  ;;  %s390_s20 = int_to_ptr.hbm [resolvable:$true] %s389_s20 }
  0x29   : > { %s387_s16 = sshll.u32 %s221_s15, 4  ;;  %s376_s19 = scalar_lea.sflag [#allocation4], %s837_s29  ;;  %s388_s16 = int_to_ptr.vmem [resolvable:$true] %s387_s16 }
  0x2a   : > { %vm302_vm1 = vcmp.eq.s32.totalorder %v299_v28, %v300_v31  ;;  %vm303_vm2 = vcmp.eq.s32.totalorder %v299_v28, %v301_v32  ;;  %s660_s27 = sshra.s32 %s390_s20, 4  ;;  %s666_s3 = scalar_lea.hbm %s907_s2, 2  ;;  %s661_s27 = int_to_ptr.hbm [resolvable:$true] %s660_s27 }
  0x2b   : > { %s662_s28 = scalar_lea.hbm %s661_s27, 1  ;;  %p667_p7 = scmp.lt.s32.totalorder %s661_s27, %s907_s2 }
  0x2c   : > { %p663_p4 = scmp.ne.s32.totalorder %s661_s27, %s662_s28  ;;  %p668_p8 = scmp.lt.s32.totalorder %s666_s3, %s662_s28 }
  0x2e   : > { %v245_v1 = vld.sshfl [vmem:[#allocation1] sm:$0xff pattern:$0x75316420]  ;;  %v246_v2 = vld.sshfl [vmem:[#allocation1 + $0x8] sm:$0xff pattern:$0x75316420]  ;;  %p664_p5 = pnand %p663_p4, %p802_p9  ;;  %p669_p10 = por %p668_p8, %p667_p7 }
  0x2f   : > { %v250_v3 = vsel %vm249_vm0, %v245_v1, -inf  ;;  %v257_v4 = vsel %vm249_vm0, %v246_v2, -inf }
  0x30   : > { %v251_v5 = vrot.slane %v250_v3, 4  ;;  %v258_v6 = vrot.slane %v257_v4, 4  ;;  %p665_p6 = pneg %p664_p5 }
  0x32   : > { %v252_v7 = vmax.f32 %v250_v3, %v251_v5  ;;  %v259_v8 = vmax.f32 %v257_v4, %v258_v6  ;;  %p670_p13 = pnand %p669_p10, %p665_p6 }
  0x34   : > { %v253_v9 = vrot.slane %v252_v7, 2  ;;  %v260_v10 = vrot.slane %v259_v8, 2 }
  0x36   : > { %v254_v11 = vmax.f32 %v252_v7, %v253_v9  ;;  %v261_v12 = vmax.f32 %v259_v8, %v260_v10 }
  0x38   : > { %v255_v13 = vrot.slane %v254_v11, 1  ;;  %v262_v14 = vrot.slane %v261_v12, 1 }
  0x3a   : > { %v256_v15 = vmax.f32 %v254_v11, %v255_v13  ;;  %v263_v16 = vmax.f32 %v261_v12, %v262_v14  ;;  %v735_v11 = vmov 0.0  }
  0x3c   : > { %v266_v17 = vrot.slane %v263_v16, 4 }
  0x3e   : > { %v267_v18 = vsel %vm249_vm0, %v256_v15, %v266_v17 }
  0x3f   : > { %v269_v19 = vsub.f32 %v224_v0, %v267_v18 }
  0x41   : > { %v270_v20 = vmul.f32 1.442695, %v269_v19 }
  0x43   : > { %580 = vpow2.f32 %v270_v20 }
  0x49   : > { %v581_v21 = vpop.eup %580 }
  0x4a   : > { %273 = vst [vmem:[#allocation1] ss:$2 sm:$0xff] %v581_v21 }
  0x51   : > { %v274_v24 = vld.sshfl [vmem:[#allocation1] sm:$0xff pattern:$0x75316420]  ;;  %v275_v25 = vld.sshfl [vmem:[#allocation1 + $0x8] sm:$0xff pattern:$0x75316420] }
  0x52   : > { %v278_v26 = vsel %vm249_vm0, %v274_v24, 0.0  ;;  %v285_v27 = vsel %vm249_vm0, %v275_v25, 0.0  ;;  %304 = vst [vmem:[#allocation1] ss:$2 sm:$0xff] %v224_v0  ;;  %v240_v0 = vsel %vm239_vm3, 1, %v238_v58 }
  0x53   : > { %v279_v29 = vrot.slane %v278_v26, 4  ;;  %v286_v30 = vrot.slane %v285_v27, 4  ;;  %vm241_vm5 = vcmp.ne.s32.totalorder %v240_v0, 0 }
  0x54   : > { %vm242_vm6 = vmand %vm233_vm4, %vm241_vm5 }
  0x55   : > { %v280_v33 = vadd.f32 %v279_v29, %v278_v26  ;;  %v287_v34 = vadd.f32 %v286_v30, %v285_v27  ;;  %v333_v12 = vsel %vm242_vm6, 1.0, %v735_v11 }
  0x56   : > { %v352_v19 = vperm.slane %v333_v12, 0 }
  0x57   : > { %v281_v35 = vrot.slane %v280_v33, 2  ;;  %v288_v36 = vrot.slane %v287_v34, 2 }
  0x58   : > { %v356_v20 = vsel %vm239_vm3, %v352_v19, 0.0 }
  0x59   : > { %v282_v37 = vadd.f32 %v281_v35, %v280_v33  ;;  %v289_v38 = vadd.f32 %v288_v36, %v287_v34  ;;  %v305_v39 = vld.sshfl [vmem:[#allocation1] sm:$0xff pattern:$0x75316420]  ;;  %v306_v40 = vld.sshfl [vmem:[#allocation1 + $0x8] sm:$0xff pattern:$0x75316420] }
  0x5a   : > { %v309_v41 = vsel %vm302_vm1, %v305_v39, 0.0  ;;  %v310_v42 = vsel %vm303_vm2, %v306_v40, 0.0 }
  0x5b   : > { %v283_v43 = vrot.slane %v282_v37, 1  ;;  %v290_v44 = vrot.slane %v289_v38, 1  ;;  %v311_v45 = vsel %vm249_vm0, %v309_v41, 0.0  ;;  %v318_v46 = vsel %vm249_vm0, %v310_v42, 0.0 }
  0x5c   : > { %v312_v47 = vrot.slane %v311_v45, 4  ;;  %v319_v48 = vrot.slane %v318_v46, 4 }
  0x5d   : > { %v284_v49 = vadd.f32 %v283_v43, %v282_v37  ;;  %v291_v50 = vadd.f32 %v290_v44, %v289_v38  ;;  %v228_v38 = vand.u32 127, %v227_v22 }
  0x5e   : > { %v313_v51 = vadd.f32 %v312_v47, %v311_v45  ;;  %v320_v52 = vadd.f32 %v319_v48, %v318_v46 }
  0x5f   : > { %582 = vlog2.f32 %v284_v49  ;;  %vm369_vm7 = vcmp.eq.s32.totalorder %v228_v38, 1  ;;  %vm368_vm8 = vcmp.eq.s32.totalorder %v228_v38, 0 }
  0x60   : > { %584 = vlog2.f32 %v291_v50  ;;  %v314_v53 = vrot.slane %v313_v51, 2  ;;  %v321_v54 = vrot.slane %v320_v52, 2 }
  0x62   : > { %v315_v55 = vadd.f32 %v314_v53, %v313_v51  ;;  %v322_v56 = vadd.f32 %v321_v54, %v320_v52 }
  0x64   : > { %v316_v59 = vrot.slane %v315_v55, 1  ;;  %v323_v60 = vrot.slane %v322_v56, 1 }
  0x65   : > { %v583_v61 = vpop.eup %582 }
  0x66   : > { %v585_v62 = vpop.eup %584  ;;  %v293_v63 = vmul.f32 0.6931472, %v583_v61  ;;  %v317_v2 = vadd.f32 %v316_v59, %v315_v55  ;;  %v324_v3 = vadd.f32 %v323_v60, %v322_v56 }
  0x67   : > { %v295_v1 = vmul.f32 0.6931472, %v585_v62 }
  0x68   : > { %v296_v4 = vadd.f32 %v293_v63, %v256_v15  ;;  %v353_v15 = vperm.slane %v333_v12, 1 }
  0x69   : > { %v297_v5 = vadd.f32 %v295_v1, %v263_v16 }
  0x6a   : > { %v325_v6 = vsub.f32 %v296_v4, %v317_v2  ;;  %v357_v21 = vsel %vm239_vm3, %v353_v15, 0.0 }
  0x6b   : > { %v326_v7 = vsub.f32 %v297_v5, %v324_v3  ;;  %v358_v23 = vadd.f32 %v357_v21, %v356_v20 }
  0x6d   : > { %v329_v8 = vrot.slane %v326_v7, 7 }
  0x6f   : > { %v330_v9 = vsel %vm239_vm3, %v325_v6, %v329_v8 }
  0x70   : > { %v332_v10 = vsel %vm242_vm6, %v330_v9, 0.0 }
  0x71   : > { %v335_v13 = vperm.slane %v332_v10, 0  ;;  %v336_v14 = vperm.slane %v332_v10, 1 }
  0x73   : > { %v339_v17 = vsel %vm239_vm3, %v335_v13, 0.0  ;;  %v340_v18 = vsel %vm239_vm3, %v336_v14, 0.0 }
  0x74   : > { %v341_v16 = vadd.f32 %v340_v18, %v339_v17 }
  0x76   : > { %342 = vadd.xlane.f32.xlu0 %v341_v16 }
  0x7e   : > { %359 = vadd.xlane.f32.xlu0 %v358_v23 }
  0xe9   : > { %v343_v24 = vpop.xlane.xlu0 %342 }
  0xea   : > { %v344_v25 = vrot.slane %v343_v24, 4 }
  0xec   : > { %v345_v26 = vadd.f32 %v344_v25, %v343_v24 }
  0xee   : > { %v346_v27 = vrot.slane %v345_v26, 2 }
  0xf0   : > { %v347_v28 = vadd.f32 %v346_v27, %v345_v26 }
  0xf1   : > { %v360_v29 = vpop.xlane.xlu0 %359 }
  0xf2   : > { %v361_v30 = vrot.slane %v360_v29, 4  ;;  %v348_v31 = vrot.slane %v347_v28, 1 }
  0xf4   : > { %v362_v32 = vadd.f32 %v361_v30, %v360_v29  ;;  %v349_v33 = vadd.f32 %v348_v31, %v347_v28 }
  0xf6   : > { %v363_v34 = vrot.slane %v362_v32, 2  ;;  %507 = vpush %v349_v33 }
  0xf8   : > { %v364_v35 = vadd.f32 %v363_v34, %v362_v32 }
  0xfa   : > { %v365_v36 = vrot.slane %v364_v35, 1 }
  0xfc   : > { %v366_v37 = vadd.f32 %v365_v36, %v364_v35 }
  0xfe   : > { %509 = vpush %v366_v37 }
 0x127   : > { %s508_s18 = spop %507 }
 0x128   : > { %v372_v40 = vstv %s508_s18 }
 0x12f   : > { %s510_s26 = spop %509 }
 0x130   : > { %v370_v39 = vstv %s510_s26 }
 0x131   : > { %v371_v41 = vsel %vm369_vm7, %v370_v39, 0.0 }
 0x132   : > { %v373_v42 = vsel %vm368_vm8, %v372_v40, %v371_v41 }
 0x133   : > { %374 = vst [vmem:[%s221_s15] sm:$0x1] %v373_v42 }
 0x134   : > { %673 = shalt.err (!%p670_p13)
}
 0x135   : > { %515 = dma.vmem_to_hbm [thread:$0]  (%p802_p9), %s388_s16, 16, %s390_s20, %s376_s19  }
 0x136 PF: > { %s401_s29 = sand.u32 1, %s712_s9   ;;  %p525_p0 = pnand %p495_p12, %p809_p11 }
 0x137   : > { %s402_s5 = scalar_lea.sflag [#allocation4], %s401_s29 }
 0x138   : > { %p526_p1 = pneg %p525_p0 }
 0x13a   : > { %707 = dma.done.wait (%p526_p1), %s402_s5, 16  }
 0x13b   : > { %709 = vsyncadd (%p526_p1), %s402_s5, 4294967280  ;;  %s21_s14 = sadd.s32 1, %s732_s14   ;;  %s913_s9 = smov %s716_s10 }
 0x13c   : > { %p18_p2 = scmp.ge.s32.totalorder %s21_s14, 4   ;;  %s914_s10 = smov %s720_s11 }
 0x13d   : > { %s915_s11 = smov %s807_s23  ;;  %s916_s12 = smov %s728_s13 }
 0x13e   : > { %s917_s13 = smov %s919_s17  ;;  %20 = sbr.rel (!%p18_p2) target bundleno = 8 (0x8), region = 86 }
 0x143   :  { %407 = vsyncpa [#allocation3], 1 }
 0x144   :  { %409 = vsyncpa [#allocation3 + $0x1], 1 }
 0x145   :  { %410 = vsyncpa [#allocation6], 1 }
 0x146   :  { %412 = vsyncpa [#allocation6 + $0x1], 1 }
 0x147   :  { %413 = vsyncpa [#allocation4], 1 }
 0x148   :  { %415 = vsyncpa [#allocation4 + $0x1], 1 }

</bundles_post_ra>
